<compile_context>
chip_gen: v6e
topology: v6e:2x2x1
jax: 0.10.0
libtpu: 0.0.40
codegen_flags: <defaults>
</compile_context>

<pallas_src>
import functools

import jax
import jax.numpy as jnp
from jax.experimental import pallas as pl
from jax.experimental.pallas import tpu as pltpu

_LANES = 128
_HIGHEST = jax.lax.Precision.HIGHEST


def _round_up(n: int, m: int) -> int:
    return ((n + m - 1) // m) * m


def _cdiv(a: int, b: int) -> int:
    return (a + b - 1) // b


def _edgecnn_kernel(x_ref, w1_ref, b1_ref, w2_ref, b2_ref, o_ref):
    # o = sigmoid(x @ W1 + b1) @ W2 + b2   (row-wise; both k=1 convs fused)
    x = x_ref[...]
    h = jnp.dot(x, w1_ref[...], precision=_HIGHEST,
                preferred_element_type=jnp.float32) + b1_ref[...]
    h = jax.nn.sigmoid(h)
    o = jnp.dot(h, w2_ref[...], precision=_HIGHEST,
                preferred_element_type=jnp.float32) + b2_ref[...]
    o_ref[...] = o.astype(o_ref.dtype)


def _vmem_limit_bytes(tile_rows: int, K: int, N: int) -> int:
    """Explicit scoped-VMEM budget (the x block lane-pads K up to 128)."""
    lane = lambda d: _round_up(max(int(d), 1), _LANES)
    # double-buffered in + double-buffered out + h/o temporaries, per row
    row_bytes = 4 * (2 * lane(K) + 2 * lane(N) + 2 * lane(N))
    # double-buffered weights / biases
    wgt_bytes = 4 * 2 * (_round_up(K, 8) * lane(N) +
                         _round_up(N, 8) * lane(N) + 2 * lane(N))
    total = tile_rows * row_bytes + wgt_bytes + (4 << 20)   # +4 MiB headroom
    return min(_round_up(total, 1 << 20), 32 << 20)


def _run_pallas(x, w1, b1, w2, b2, tile_rows):
    """x: [R, K], w1: [K, N], b1: [1, N], w2: [N, N], b2: [1, N] -> [R, N]."""
    R, K = x.shape
    N = w1.shape[1]
    # Row tile: multiple of 8, capped at 8192 rows, capped so the parallel
    # grid axis has >= ~4 steps (v7x has 2 TensorCores), and never (much)
    # larger than the input itself.
    tile_rows = _round_up(max(int(tile_rows), 8), 8)
    parallel_cap = _round_up(_cdiv(R, 4), 8)
    tile_rows = max(8, min(tile_rows, 8192, parallel_cap, _round_up(R, 8)))
    grid = (_cdiv(R, tile_rows),)
    return pl.pallas_call(
        _edgecnn_kernel,
        out_shape=jax.ShapeDtypeStruct((R, N), jnp.float32),
        grid_spec=pltpu.PrefetchScalarGridSpec(
            num_scalar_prefetch=0,
            grid=grid,
            in_specs=[
                pl.BlockSpec((tile_rows, K), lambda i: (i, 0)),
                pl.BlockSpec((K, N), lambda i: (0, 0)),
                pl.BlockSpec((1, N), lambda i: (0, 0)),
                pl.BlockSpec((N, N), lambda i: (0, 0)),
                pl.BlockSpec((1, N), lambda i: (0, 0)),
            ],
            out_specs=pl.BlockSpec((tile_rows, N), lambda i: (i, 0)),
        ),
        compiler_params=pltpu.CompilerParams(
            dimension_semantics=("parallel",),
            vmem_limit_bytes=_vmem_limit_bytes(tile_rows, K, N),
        ),
    )(x, w1, b1, w2, b2)


def pack_edge_cnn_params(w1, b1, w2, b2):
    """Pack Conv1d params into matmul form.  Call ONCE per parameter set.

    w1: [Cout, Cin, 1], b1: [Cout], w2: [Cout, Cout, 1], b2: [Cout].
    Lane packing: `pack = 128 // Cout` consecutive edges share one 128-lane
    output row; the two 1x1 convs become block-diagonal matmuls kron(I, W),
    so the kernel needs no in-kernel reshape/transpose (no XLU pass).
    """
    Cout, Cin = int(w1.shape[0]), int(w1.shape[1])
    w1t = jnp.asarray(w1, jnp.float32).reshape(Cout, Cin).T      # [Cin, Cout]
    w2t = jnp.asarray(w2, jnp.float32).reshape(Cout, Cout).T     # [Cout, Cout]
    b1r = jnp.asarray(b1, jnp.float32).reshape(1, Cout)
    b2r = jnp.asarray(b2, jnp.float32).reshape(1, Cout)

    pack = _LANES // Cout if (0 < Cout < _LANES and _LANES % Cout == 0) else 1
    if pack > 1:
        eye = jnp.eye(pack, dtype=jnp.float32)
        w1p = jnp.kron(eye, w1t)                       # [pack*Cin, pack*Cout]
        w2p = jnp.kron(eye, w2t)                       # [pack*Cout, pack*Cout]
        b1p = jnp.tile(b1r, (1, pack))                 # [1, pack*Cout]
        b2p = jnp.tile(b2r, (1, pack))                 # [1, pack*Cout]
    else:
        w1p, w2p, b1p, b2p = w1t, w2t, b1r, b2r

    return {"w1t": w1t, "b1": b1r, "w2t": w2t, "b2": b2r,
            "w1p": w1p, "b1p": b1p, "w2p": w2p, "b2p": b2p}


@functools.partial(jax.jit, static_argnames=("tile_e",))
def edge_cnn_forward(edge_attr, params, *, tile_e=16384):
    """edge_attr: [E, Cin] f32 -> [E, Cout] f32  (== EdgeCNN.forward)."""
    E, Cin = edge_attr.shape
    w1t, b1, w2t, b2 = params["w1t"], params["b1"], params["w2t"], params["b2"]
    w1p, b1p, w2p, b2p = params["w1p"], params["b1p"], params["w2p"], params["b2p"]
    Cout = w1t.shape[1]
    pack = w1p.shape[0] // Cin          # static under jit (from shapes)

    if pack <= 1:
        # Cout does not divide 128: plain row-tiled kernel (lane-sparse out).
        return _run_pallas(edge_attr, w1t, b1, w2t, b2, tile_e)

    # Lane-packed main body + tiny XLA tail (never demote the whole array).
    E_main = (E // pack) * pack
    pieces = []
    if E_main > 0:
        x = edge_attr[:E_main].reshape(E_main // pack, pack * Cin)  # free view
        out = _run_pallas(x, w1p, b1p, w2p, b2p, max(8, tile_e // pack))
        pieces.append(out.reshape(E_main, Cout))
    if E_main < E:
        xt = edge_attr[E_main:]                         # <= pack-1 edges
        ht = jax.nn.sigmoid(
            jnp.dot(xt, w1t, precision=_HIGHEST) + b1)
        pieces.append(jnp.dot(ht, w2t, precision=_HIGHEST) + b2)
    return pieces[0] if len(pieces) == 1 else jnp.concatenate(pieces, axis=0)


def _reference(edge_attr, w1, b1, w2, b2):
    Cout, Cin = w1.shape[0], w1.shape[1]
    h = jax.nn.sigmoid(edge_attr @ w1.reshape(Cout, Cin).T + b1)
    return h @ w2.reshape(Cout, Cout).T + b2


if __name__ == "__main__":
    key = jax.random.PRNGKey(0)
    k_x, k_w1, k_b1, k_w2, k_b2, k_x2 = jax.random.split(key, 6)

    # Small shapes consistent with the module: E edges, Cin -> Cout features.
    E, Cin, Cout = 200, 4, 32

    edge_attr = jax.random.normal(k_x, (E, Cin), dtype=jnp.float32)

    # Conv1d parameter shapes: weight [Cout, Cin, 1], bias [Cout].
    w1 = jax.random.normal(k_w1, (Cout, Cin, 1), dtype=jnp.float32) * 0.1
    b1 = jax.random.normal(k_b1, (Cout,), dtype=jnp.float32) * 0.1
    w2 = jax.random.normal(k_w2, (Cout, Cout, 1), dtype=jnp.float32) * 0.1
    b2 = jax.random.normal(k_b2, (Cout,), dtype=jnp.float32) * 0.1

    # Weight packing hoisted out of the forward: done once per parameter set.
    params = pack_edge_cnn_params(w1, b1, w2, b2)

    # Lane-packed path (E divisible by pack=4).
    out = jax.block_until_ready(edge_cnn_forward(edge_attr, params))
    ref = _reference(edge_attr, w1, b1, w2, b2)
    assert out.shape == (E, Cout), out.shape
    assert jnp.allclose(out, ref, atol=1e-5, rtol=1e-5), "mismatch vs reference"

    # Ragged-E path: packed kernel on the first 200 edges + XLA tail for 1.
    E2 = 201
    edge_attr2 = jax.random.normal(k_x2, (E2, Cin), dtype=jnp.float32)
    out2 = jax.block_until_ready(edge_cnn_forward(edge_attr2, params))
    ref2 = _reference(edge_attr2, w1, b1, w2, b2)
    assert out2.shape == (E2, Cout), out2.shape
    assert jnp.allclose(out2, ref2, atol=1e-5, rtol=1e-5), "mismatch (tail path)"

    print("KERNEL_OK")
</pallas_src>

<mosaic_0001>
module attributes {stable_mosaic.version = 11 : i64} {
  func.func @_edgecnn_kernel(%arg0: i32, %arg1: memref<16x16xf32, #tpu.memory_space<vmem>>, %arg2: memref<16x128xf32, #tpu.memory_space<vmem>>, %arg3: memref<1x128xf32, #tpu.memory_space<vmem>>, %arg4: memref<128x128xf32, #tpu.memory_space<vmem>>, %arg5: memref<1x128xf32, #tpu.memory_space<vmem>>, %arg6: memref<16x128xf32, #tpu.memory_space<vmem>>) attributes {dimension_semantics = [#tpu.dimension_semantics<parallel>], iteration_bounds = array<i64: 4>, scalar_prefetch = 0 : i64, scratch_operands = 0 : i64, tpu.core_type = #tpu.core_type<tc>, window_params = [{transform_indices = @transform_0, window_bounds = array<i64: 16, 16>}, {pipeline_mode = #tpu.pipeline_mode<synchronous>, transform_indices = @transform_1, window_bounds = array<i64: 16, 128>}, {pipeline_mode = #tpu.pipeline_mode<synchronous>, transform_indices = @transform_2, window_bounds = array<i64: 1, 128>}, {pipeline_mode = #tpu.pipeline_mode<synchronous>, transform_indices = @transform_3, window_bounds = array<i64: 128, 128>}, {pipeline_mode = #tpu.pipeline_mode<synchronous>, transform_indices = @transform_4, window_bounds = array<i64: 1, 128>}, {transform_indices = @transform_5, window_bounds = array<i64: 16, 128>}]} {
    %c0 = arith.constant 0 : index
    %c0_0 = arith.constant 0 : index
    %0 = vector.load %arg1[%c0, %c0_0] : memref<16x16xf32, #tpu.memory_space<vmem>>, vector<16x16xf32>
    %c0_1 = arith.constant 0 : index
    %c0_2 = arith.constant 0 : index
    %1 = vector.load %arg2[%c0_1, %c0_2] : memref<16x128xf32, #tpu.memory_space<vmem>>, vector<16x128xf32>
    %cst = arith.constant dense<0.000000e+00> : vector<16x128xf32>
    %2 = tpu.matmul %0, %1, %cst {dimension_numbers = #tpu.dot_dimension_numbers<[1], [0], [0], [1], [0, 0, 1, 1], [], []>, precision = #tpu.contract_precision<fp32>} : vector<16x16xf32>, vector<16x128xf32>, vector<16x128xf32> -> vector<16x128xf32>
    %c0_3 = arith.constant 0 : index
    %c0_4 = arith.constant 0 : index
    %3 = vector.load %arg3[%c0_3, %c0_4] : memref<1x128xf32, #tpu.memory_space<vmem>>, vector<1x128xf32>
    %4 = vector.broadcast %3 : vector<1x128xf32> to vector<16x128xf32>
    %5 = arith.addf %2, %4 : vector<16x128xf32>
    %6 = arith.negf %5 : vector<16x128xf32>
    %7 = math.exp %6 : vector<16x128xf32>
    %cst_5 = arith.constant 1.000000e+00 : f32
    %8 = vector.broadcast %cst_5 : f32 to vector<16x128xf32>
    %9 = arith.addf %8, %7 : vector<16x128xf32>
    %10 = arith.divf %8, %9 : vector<16x128xf32>
    %c0_6 = arith.constant 0 : index
    %c0_7 = arith.constant 0 : index
    %11 = vector.load %arg4[%c0_6, %c0_7] : memref<128x128xf32, #tpu.memory_space<vmem>>, vector<128x128xf32>
    %cst_8 = arith.constant dense<0.000000e+00> : vector<16x128xf32>
    %12 = tpu.matmul %10, %11, %cst_8 {dimension_numbers = #tpu.dot_dimension_numbers<[1], [0], [0], [1], [0, 0, 1, 1], [], []>, precision = #tpu.contract_precision<fp32>} : vector<16x128xf32>, vector<128x128xf32>, vector<16x128xf32> -> vector<16x128xf32>
    %c0_9 = arith.constant 0 : index
    %c0_10 = arith.constant 0 : index
    %13 = vector.load %arg5[%c0_9, %c0_10] : memref<1x128xf32, #tpu.memory_space<vmem>>, vector<1x128xf32>
    %14 = vector.broadcast %13 : vector<1x128xf32> to vector<16x128xf32>
    %15 = arith.addf %12, %14 : vector<16x128xf32>
    %c0_11 = arith.constant 0 : index
    %c0_12 = arith.constant 0 : index
    %16 = vector.load %arg6[%c0_11, %c0_12] : memref<16x128xf32, #tpu.memory_space<vmem>>, vector<16x128xf32>
    tpu.vector_store %arg6[%c0_11, %c0_12], %15 {strides = array<i32>} : memref<16x128xf32, #tpu.memory_space<vmem>>, vector<16x128xf32>,
    return
  }
  func.func @transform_0(%arg0: i32) -> (i32, i32) {
    %c0_i32 = arith.constant 0 : i32
    %c0_i32_0 = arith.constant 0 : i32
    return %arg0, %c0_i32 : i32, i32
  }
  func.func @transform_1(%arg0: i32) -> (i32, i32) {
    %c0_i32 = arith.constant 0 : i32
    %c0_i32_0 = arith.constant 0 : i32
    %c0_i32_1 = arith.constant 0 : i32
    return %c0_i32, %c0_i32_0 : i32, i32
  }
  func.func @transform_2(%arg0: i32) -> (i32, i32) {
    %c0_i32 = arith.constant 0 : i32
    %c0_i32_0 = arith.constant 0 : i32
    %c0_i32_1 = arith.constant 0 : i32
    return %c0_i32, %c0_i32_0 : i32, i32
  }
  func.func @transform_3(%arg0: i32) -> (i32, i32) {
    %c0_i32 = arith.constant 0 : i32
    %c0_i32_0 = arith.constant 0 : i32
    %c0_i32_1 = arith.constant 0 : i32
    return %c0_i32, %c0_i32_0 : i32, i32
  }
  func.func @transform_4(%arg0: i32) -> (i32, i32) {
    %c0_i32 = arith.constant 0 : i32
    %c0_i32_0 = arith.constant 0 : i32
    %c0_i32_1 = arith.constant 0 : i32
    return %c0_i32, %c0_i32_0 : i32, i32
  }
  func.func @transform_5(%arg0: i32) -> (i32, i32) {
    %c0_i32 = arith.constant 0 : i32
    %c0_i32_0 = arith.constant 0 : i32
    return %arg0, %c0_i32 : i32, i32
  }
}

</mosaic_0001>

<bundles_post_ra>
// kernel: edge_cnn_forward.1
= control target key start
LH: loop header
LB: loop body
LE: loop exit
PB: predicated region body
PF: predicated region fallthrough
CT: control target
= control target key end

     0   :  { %s2336_s18 = smov 0   ;;  %s2338_s19 = smov 0   ;;  %s2820_s0 = inlined_call_operand.vmem [shape: f32[50,16], index: 0, kind: input, shape index: {}]   ;;  %s2821_s1 = inlined_call_operand.vmem [shape: f32[16,128], index: 1, kind: input, shape index: {}]   ;;  %s2822_s2 = inlined_call_operand.vmem [shape: f32[1,128], index: 2, kind: input, shape index: {}]   ;;  %s2823_s3 = inlined_call_operand.vmem [shape: f32[128,128], index: 3, kind: input, shape index: {}]   ;;  %s2824_s4 = inlined_call_operand.vmem [shape: f32[1,128], index: 4, kind: input, shape index: {}]   ;;  %s2825_s5 = inlined_call_operand.vmem [shape: f32[50,128], index: 5, kind: output, shape index: {}]  }
   0x1   :  { %s2340_s20 = smov 0  }
   0x2 LB: > { %s2349_s21 = sadd.s32 4294967295, %s2272_s20   ;;  %s2351_s22 = sadd.s32 1, %s2272_s20   ;;  %s2272_s20 = sphi %s2340_s20, %s2865_s20   ;;  %s2268_s19 = sphi %s2338_s19, %s2864_s19   ;;  %s2264_s18 = sphi %s2336_s18, %s2863_s18  }
   0x3   : > { %s129_s23 = ssub.s32 %s2272_s20, %s2351_s22  ;;  %s132_s24 = sadd.s32 1, %s2268_s19 }
   0x4   : > { %p130_p0 = scmp.eq.s32.totalorder %s129_s23, 0  ;;  %p142_p1 = scmp.ne.s32.totalorder %s2268_s19, %s2264_s18 }
   0x5   : > { %p143_p2 = scmp.eq.s32.totalorder %s2349_s21, 3  ;;  %p1710_p3 = scmp.ge.s32.totalorder %s2272_s20, 1 }
   0x6   : > { %s2359_s25 = scalar_select %p130_p0, %s2268_s19, %s132_s24  }
   0x7   : > { %p2361_p4 = por %p143_p2, %p142_p1  ;;  %p196_p5 = scmp.lt.s32.totalorder %s2272_s20, 5 }
   0x9   : > { %p197_p6 = pnand %p1710_p3, %p196_p5 }
   0xb   : > { %200 = sbr.rel (%p197_p6) target bundleno = 591 (0x24f), region = 40 }
  0x10   : > { %v249_v0 = vld [vmem:[%s2821_s1 + $0x8] sm:$0xff]  ;;  %v248_v1 = vld [vmem:[%s2821_s1] sm:$0xff]  ;;  %s2372_s6 = sshll.u32 %s2349_s21, 1  ;;  %vm257_vm0 = vcmask 130048   ;;  %v793_v26 = vld [vmem:[%s2823_s3 + $0x78] sm:$0xff]  ;;  %s224_s12 = sand.u32 1, %s2264_s18  }
  0x11   : > { %v293_v2 = vand.u32 4294901760, %v249_v0  ;;  %v296_v3 = vand.u32 4294901760, %v248_v1  ;;  %p232_p7 = scmp.lt.s32.totalorder %s2372_s6, 6  ;;  %v2382_v27 = vand.u32 4294901760, %v793_v26  ;;  %v792_v28 = vld [vmem:[%s2823_s3 + $0x70] sm:$0xff]  ;;  %v791_v31 = vld [vmem:[%s2823_s3 + $0x68] sm:$0xff] }
  0x12   : > { %v2390_v30 = vand.u32 4294901760, %v792_v28  ;;  %v2403_v34 = vand.u32 4294901760, %v791_v31  ;;  %v790_v35 = vld [vmem:[%s2823_s3 + $0x60] sm:$0xff]  ;;  %v789_v40 = vld [vmem:[%s2823_s3 + $0x58] sm:$0xff]  ;;  %v788_v46 = vld [vmem:[%s2823_s3 + $0x50] sm:$0xff]  ;;  %s1711_s13 = sshll.u32 %s224_s12, 4 }
  0x13   : > { %1870 = vmatprep.subr.mxu0 %v293_v2  ;;  %v381_v4 = vsub.f32 %v249_v0, %v293_v2  ;;  %v388_v5 = vsub.f32 %v248_v1, %v296_v3  ;;  %s233_s7 = scalar_select %p232_p7, %s2372_s6, 6  ;;  %v2388_v29 = vsub.f32 %v793_v26, %v2382_v27  ;;  %v2418_v39 = vand.u32 4294901760, %v790_v35  ;;  %v787_v52 = vld [vmem:[%s2823_s3 + $0x48] sm:$0xff]  ;;  %v786_v58 = vld [vmem:[%s2823_s3 + $0x40] sm:$0xff]  ;;  %v785_v0 = vld [vmem:[%s2823_s3 + $0x38] sm:$0xff] }
  0x14   : > { %1871 = vmatpush3.msra.mxu0 %v293_v2  ;;  %v2401_v33 = vsub.f32 %v792_v28, %v2390_v30  ;;  %v2416_v38 = vsub.f32 %v791_v31, %v2403_v34  ;;  %v2434_v45 = vand.u32 4294901760, %v789_v40  ;;  %v2445_v50 = vand.u32 4294901760, %v788_v46  ;;  %s2775_s14 = scalar_lea.vmem [#allocation2], %s1711_s13   ;;  %s1495_s18 = ssub.s32 (%p2361_p4), 7, %s2372_s6 }
  0x15   : > { %v382_v6 = vand.u32 4294901760, %v381_v4  ;;  %1872 = vmatprep.subr.mxu0 %v296_v3  ;;  %v389_v7 = vand.u32 4294901760, %v388_v5  ;;  %s1713_s8 = sshll.u32 %s233_s7, 3  ;;  %v2398_v32 = vand.u32 4294901760, %v2388_v29  ;;  %v2431_v44 = vsub.f32 %v790_v35, %v2418_v39  ;;  %s1735_s15 = sshll.u32 (%p2361_p4), %s2349_s21, 4 }
  0x16   : > { %1873 = vmatpush3.msra.mxu0 %v296_v3  ;;  %s235_s11 = scalar_lea.vmem %s2820_s0, %s1713_s8  ;;  %v2413_v37 = vand.u32 4294901760, %v2401_v33  ;;  %v2428_v43 = vand.u32 4294901760, %v2416_v38  ;;  %v2448_v51 = vsub.f32 %v789_v40, %v2434_v45  ;;  %v2457_v55 = vsub.f32 %v788_v46, %v2445_v50  ;;  %p1496_p8 = scmp.lt.s32.totalorder (%p2361_p4), %s1495_s18, 2 }
  0x17   : > { %v383_v8 = vsub.f32 %v381_v4, %v382_v6  ;;  %v390_v9 = vsub.f32 %v388_v5, %v389_v7  ;;  %v246_v10 = vld [vmem:[%s235_s11] sm:$0xff]  ;;  %v247_v11 = vld [vmem:[%s235_s11 + $0x8] sm:$0xff]  ;;  %1884 = vmatprep.subr.mxu0 %v381_v4  ;;  %v906_v36 = vsub.f32 %v2388_v29, %v2398_v32  ;;  %v2443_v49 = vand.u32 4294901760, %v2431_v44  ;;  %s2786_s20 = scalar_lea.vmem (%p2361_p4), %s2825_s5, %s1735_s15  }
  0x18   : > { %v259_v12 = vsel %vm257_vm0, %v246_v10, 0  ;;  %v262_v13 = vsel %vm257_vm0, %v247_v11, 0  ;;  %v913_v42 = vsub.f32 %v2401_v33, %v2413_v37  ;;  %v920_v48 = vsub.f32 %v2416_v38, %v2428_v43 }
  0x19   : > { %v384_v14 = vand.u32 4294901760, %v383_v8  ;;  %v391_v15 = vand.u32 4294901760, %v390_v9  ;;  %v331_v16 = vand.u32 4294901760, %v259_v12  ;;  %v341_v17 = vand.u32 4294901760, %v262_v13 }
  0x1a   : > { %v907_v41 = vand.u32 4294901760, %v906_v36  ;;  %v914_v47 = vand.u32 4294901760, %v913_v42  ;;  %v921_v53 = vand.u32 4294901760, %v920_v48  ;;  %v927_v54 = vsub.f32 %v2431_v44, %v2443_v49  ;;  %v780_v36 = vld [vmem:[%s2823_s3 + $0x10] sm:$0xff]  ;;  %v778_v48 = vld [vmem:[%s2823_s3] sm:$0xff] }
  0x1b   : > { %1877 = vmatprep.subr.mxu1 %v384_v14  ;;  %v332_v18 = vsub.f32 %v259_v12, %v331_v16  ;;  %1881 = vmatprep.mubr.f32.mxu1 %v331_v16  ;;  %v342_v19 = vsub.f32 %v262_v13, %v341_v17  ;;  %v2459_v56 = vand.u32 4294901760, %v787_v52  ;;  %v2463_v57 = vand.u32 4294901760, %v2448_v51  ;;  %v783_v12 = vld [vmem:[%s2823_s3 + $0x28] sm:$0xff] }
  0x1c   : > { %1878 = vmatpush3.msra.mxu1 %v384_v14  ;;  %v928_v59 = vand.u32 4294901760, %v927_v54  ;;  %v2470_v60 = vand.u32 4294901760, %v2457_v55  ;;  %v2475_v62 = vand.u32 4294901760, %v786_v58  ;;  %v2567_v46 = vand.u32 4294901760, %v780_v36 }
  0x1d   : > { %1879 = vmatprep.subr.mxu1 %v391_v15  ;;  %v333_v20 = vand.u32 4294901760, %v332_v18  ;;  %v343_v21 = vand.u32 4294901760, %v342_v19  ;;  %v2473_v61 = vsub.f32 %v787_v52, %v2459_v56  ;;  %v934_v63 = vsub.f32 %v2448_v51, %v2463_v57 }
  0x1e   : > { %1880 = vmatpush3.msra.mxu1 %v391_v15  ;;  %v941_v1 = vsub.f32 %v2457_v55, %v2470_v60  ;;  %v2578_v54 = vand.u32 4294901760, %v778_v48 }
  0x1f   : > { %v334_v22 = vsub.f32 %v332_v18, %v333_v20  ;;  %v344_v23 = vsub.f32 %v342_v19, %v343_v21  ;;  %1882 = vmatmul.mubr.f32.vlgmr.msra.gmra.mxu1 %v341_v17  ;;  %1891 = vmatprep.subr.mxu1 %v293_v2 }
  0x20   : > { %1892 = vmatpush3.msra.mxu1 %v293_v2  ;;  %1895 = vmatprep.mubr.f32.mxu1 %v333_v20 }
  0x21   : > { %v335_v24 = vand.u32 4294901760, %v334_v22  ;;  %v345_v25 = vand.u32 4294901760, %v344_v23  ;;  %1893 = vmatprep.subr.mxu1 %v296_v3 }
  0x22   : > { %1894 = vmatpush3.msra.mxu1 %v296_v3 }
  0x23   : > { %1874 = vmatprep.mubr.f32.mxu0 %v335_v24  ;;  %1896 = vmatmul.mubr.f32.vlgmr.msra.gmra.mxu1 %v343_v21  ;;  %v781_v24 = vld [vmem:[%s2823_s3 + $0x18] sm:$0xff] }
  0x24   : > { %1875 = vmatmul.mubr.f32.vlgmr.msra.gmra.mxu0 %v345_v25  ;;  %1905 = vmatprep.subr.mxu1 %v293_v2  ;;  %v2550_v31 = vand.u32 4294901760, %v781_v24 }
  0x25   : > { %1885 = vmatpush3.msra.mxu0 %v381_v4  ;;  %1888 = vmatprep.mubr.f32.mxu0 %v332_v18  ;;  %v2492_v4 = vand.u32 4294901760, %v785_v0  ;;  %v782_v18 = vld [vmem:[%s2823_s3 + $0x20] sm:$0xff] }
  0x26   : > { %1886 = vmatprep.subr.mxu0 %v388_v5  ;;  %1906 = vmatpush3.msra.mxu1 %v293_v2  ;;  %v2487_v2 = vand.u32 4294901760, %v2473_v61  ;;  %v2534_v22 = vand.u32 4294901760, %v782_v18  ;;  %v2565_v42 = vsub.f32 %v781_v24, %v2550_v31 }
  0x27   : > { %1887 = vmatpush3.msra.mxu0 %v388_v5  ;;  %1907 = vmatprep.subr.mxu1 %v296_v3  ;;  %v935_v5 = vand.u32 4294901760, %v934_v63  ;;  %v2505_v10 = vsub.f32 %v785_v0, %v2492_v4  ;;  %v2587_v0 = vsub.f32 %v780_v36, %v2567_v46 }
  0x28   : > { %1898 = vmatprep.subr.mxu0 %v382_v6  ;;  %1889 = vmatmul.mubr.f32.vlgmr.msra.gmra.mxu0 %v342_v19  ;;  %v948_v8 = vsub.f32 %v2473_v61, %v2487_v2  ;;  %v2548_v28 = vsub.f32 %v782_v18, %v2534_v22  ;;  %v2584_v63 = vand.u32 4294901760, %v2565_v42 }
  0x29   : > { %1899 = vmatpush3.msra.mxu0 %v382_v6  ;;  %1902 = vmatprep.mubr.f32.mxu0 %v331_v16  ;;  %v784_v6 = vld [vmem:[%s2823_s3 + $0x30] sm:$0xff]  ;;  %v2517_v15 = vand.u32 4294901760, %v2505_v10 }
  0x2a   : > { %1900 = vmatprep.subr.mxu0 %v389_v7  ;;  %1908 = vmatpush3.msra.mxu1 %v296_v3  ;;  %v2490_v3 = vsub.f32 %v786_v58, %v2475_v62  ;;  %v2508_v11 = vand.u32 4294901760, %v784_v6  ;;  %v949_v13 = vand.u32 4294901760, %v948_v8  ;;  %2850 = vst [vmem:[#allocation8_spill] sm:$0xff] %v2584_v63  ;;  %v2600_v8 = vand.u32 4294901760, %v2587_v0 }
  0x2b   : > { %1901 = vmatpush3.msra.mxu0 %v389_v7  ;;  %1909 = vmatprep.mubr.f32.mxu1 %v331_v16  ;;  %v942_v7 = vand.u32 4294901760, %v941_v1  ;;  %2846 = vst [vmem:[#allocation4_spill] sm:$0xff] %v2517_v15  ;;  %v2519_v16 = vand.u32 4294901760, %v783_v12  ;;  %v962_v20 = vsub.f32 %v2505_v10, %v2517_v15 }
  0x2c   : > { %1903 = vmatmul.mubr.f32.vlgmr.msra.gmra.mxu0 %v341_v17  ;;  %1910 = vmatmul.mubr.f32.vlgmr.msra.gmra.mxu1 %v341_v17  ;;  %v2502_v9 = vand.u32 4294901760, %v2490_v3  ;;  %v2523_v17 = vsub.f32 %v784_v6, %v2508_v11  ;;  %2851 = vst [vmem:[#allocation9_spill] sm:$0xff] %v2600_v8  ;;  %v997_v18 = vsub.f32 %v2587_v0, %v2600_v8 }
  0x2d   : > { %1912 = vmatprep.subr.mxu0 %v2382_v27  ;;  %1947 = vmatprep.subr.mxu1 %v907_v41  ;;  %v2532_v21 = vsub.f32 %v783_v12, %v2519_v16  ;;  %v963_v25 = vand.u32 4294901760, %v962_v20 }
  0x2e   : > { %1913 = vmatpush3.msra.mxu0 %v2382_v27  ;;  %1948 = vmatpush3.msra.mxu1 %v907_v41  ;;  %2845 = vst [vmem:[#allocation3_spill] sm:$0xff] %v2502_v9  ;;  %v955_v14 = vsub.f32 %v2490_v3, %v2502_v9  ;;  %v2538_v23 = vand.u32 4294901760, %v2523_v17  ;;  %v2562_v41 = vand.u32 4294901760, %v2548_v28  ;;  %v998_v24 = vand.u32 4294901760, %v997_v18 }
  0x2f   : > { %1914 = vmatprep.subr.mxu0 %v2390_v30  ;;  %1949 = vmatprep.subr.mxu1 %v914_v47  ;;  %v2545_v26 = vand.u32 4294901760, %v2532_v21 }
  0x30   : > { %1915 = vmatpush3.msra.mxu0 %v2390_v30  ;;  %1950 = vmatpush3.msra.mxu1 %v914_v47  ;;  %v956_v19 = vand.u32 4294901760, %v955_v14  ;;  %2847 = vst [vmem:[#allocation5_spill] sm:$0xff] %v2538_v23  ;;  %v969_v35 = vsub.f32 %v2523_v17, %v2538_v23  ;;  %2849 = vst [vmem:[#allocation7_spill] sm:$0xff] %v2562_v41  ;;  %v779_v47 = vld [vmem:[%s2823_s3 + $0x8] sm:$0xff] }
  0x31   : > { %1916 = vmatprep.subr.mxu0 %v2403_v34  ;;  %1951 = vmatprep.subr.mxu1 %v921_v53  ;;  %2848 = vst [vmem:[#allocation6_spill] sm:$0xff] %v2545_v26  ;;  %v976_v40 = vsub.f32 %v2532_v21, %v2545_v26 }
  0x32   : > { %1917 = vmatpush3.msra.mxu0 %v2403_v34  ;;  %1952 = vmatpush3.msra.mxu1 %v921_v53  ;;  %v970_v52 = vand.u32 4294901760, %v969_v35  ;;  %v2576_v53 = vand.u32 4294901760, %v779_v47 }
  0x33   : > { %1918 = vmatprep.subr.mxu0 %v2418_v39  ;;  %1953 = vmatprep.subr.mxu1 %v928_v59  ;;  %v977_v58 = vand.u32 4294901760, %v976_v40 }
  0x34   : > { %1919 = vmatpush3.msra.mxu0 %v2418_v39  ;;  %1954 = vmatpush3.msra.mxu1 %v928_v59  ;;  %v983_v59 = vsub.f32 %v2548_v28, %v2562_v41  ;;  %v2591_v1 = vsub.f32 %v779_v47, %v2576_v53  ;;  %v1714_v47 = vld [vmem:[%s2822_s2] ss:$0 sm:$0xff] }
  0x35   : > { %1920 = vmatprep.subr.mxu0 %v2434_v45  ;;  %1955 = vmatprep.subr.mxu1 %v935_v5 }
  0x36   : > { %1921 = vmatpush3.msra.mxu0 %v2434_v45  ;;  %1956 = vmatpush3.msra.mxu1 %v935_v5  ;;  %v2594_v5 = vsub.f32 %v778_v48, %v2578_v54  ;;  %v984_v6 = vand.u32 4294901760, %v983_v59  ;;  %v2604_v12 = vand.u32 4294901760, %v2591_v1 }
  0x37   : > { %1922 = vmatprep.subr.mxu0 %v2445_v50  ;;  %1957 = vmatprep.subr.mxu1 %v942_v7 }
  0x38   : > { %1923 = vmatpush3.msra.mxu0 %v2445_v50  ;;  %1958 = vmatpush3.msra.mxu1 %v942_v7  ;;  %v990_v7 = vsub.f32 %v2565_v42, %v2584_v63  ;;  %2852 = vst [vmem:[#allocation10_spill] sm:$0xff] %v2604_v12 }
  0x39   : > { %1924 = vmatprep.subr.mxu0 %v2459_v56  ;;  %1959 = vmatprep.subr.mxu1 %v949_v13 }
  0x3a   : > { %1925 = vmatpush3.msra.mxu0 %v2459_v56  ;;  %1960 = vmatpush3.msra.mxu1 %v949_v13  ;;  %v2607_v13 = vand.u32 4294901760, %v2594_v5  ;;  %v991_v14 = vand.u32 4294901760, %v990_v7 }
  0x3b   : > { %1926 = vmatprep.subr.mxu0 %v2475_v62  ;;  %1961 = vmatprep.subr.mxu1 %v956_v19 }
  0x3c   : > { %1927 = vmatpush3.msra.mxu0 %v2475_v62  ;;  %1962 = vmatpush3.msra.mxu1 %v956_v19  ;;  %2853 = vst [vmem:[#allocation11_spill] sm:$0xff] %v2607_v13  ;;  %v1004_v19 = vsub.f32 %v2591_v1, %v2604_v12  ;;  %v1011_v20 = vsub.f32 %v2594_v5, %v2607_v13 }
  0x3d   : > { %1928 = vmatprep.subr.mxu0 %v2492_v4  ;;  %1963 = vmatprep.subr.mxu1 %v963_v25 }
  0x3e   : > { %1929 = vmatpush3.msra.mxu0 %v2492_v4  ;;  %1964 = vmatpush3.msra.mxu1 %v963_v25  ;;  %v1005_v25 = vand.u32 4294901760, %v1004_v19  ;;  %v1012_v35 = vand.u32 4294901760, %v1011_v20 }
  0x3f   : > { %1930 = vmatprep.subr.mxu0 %v2508_v11  ;;  %1965 = vmatprep.subr.mxu1 %v970_v52 }
  0x40   : > { %1931 = vmatpush3.msra.mxu0 %v2508_v11  ;;  %1966 = vmatpush3.msra.mxu1 %v970_v52 }
  0x41   : > { %1932 = vmatprep.subr.mxu0 %v2519_v16  ;;  %1967 = vmatprep.subr.mxu1 %v977_v58 }
  0x42   : > { %1933 = vmatpush3.msra.mxu0 %v2519_v16  ;;  %1968 = vmatpush3.msra.mxu1 %v977_v58 }
  0x43   : > { %1934 = vmatprep.subr.mxu0 %v2534_v22  ;;  %1969 = vmatprep.subr.mxu1 %v984_v6 }
  0x44   : > { %1935 = vmatpush3.msra.mxu0 %v2534_v22  ;;  %1970 = vmatpush3.msra.mxu1 %v984_v6 }
  0x45   : > { %1936 = vmatprep.subr.mxu0 %v2550_v31  ;;  %1971 = vmatprep.subr.mxu1 %v991_v14 }
  0x46   : > { %1937 = vmatpush3.msra.mxu0 %v2550_v31  ;;  %1972 = vmatpush3.msra.mxu1 %v991_v14 }
  0x47   : > { %1938 = vmatprep.subr.mxu0 %v2567_v46  ;;  %1973 = vmatprep.subr.mxu1 %v998_v24 }
  0x48   : > { %1939 = vmatpush3.msra.mxu0 %v2567_v46  ;;  %1974 = vmatpush3.msra.mxu1 %v998_v24 }
  0x49   : > { %1940 = vmatprep.subr.mxu0 %v2576_v53  ;;  %1975 = vmatprep.subr.mxu1 %v1005_v25 }
  0x4a   : > { %1941 = vmatpush3.msra.mxu0 %v2576_v53  ;;  %1976 = vmatpush3.msra.mxu1 %v1005_v25 }
  0x4b   : > { %1942 = vmatprep.subr.mxu0 %v2578_v54  ;;  %1977 = vmatprep.subr.mxu1 %v1012_v35 }
  0x4c   : > { %1943 = vmatpush3.msra.mxu0 %v2578_v54  ;;  %1978 = vmatpush3.msra.mxu1 %v1012_v35 }
  0x4d   : > { %1982 = vmatprep.subr.mxu0 %v2388_v29  ;;  %2017 = vmatprep.subr.mxu1 %v2382_v27 }
  0xdf   : > { %v1883_v36 = vpop.f32.mrf.mxu1 }
  0xe1   : > { %v428_v40 = vpop.f32.mrf.mxu1 }
  0xe3   : > { %v1897_v52 = vpop.f32.mrf.mxu1 }
  0xe4   : > { %v1876_v48 = vpop.f32.mrf.mxu0 }
  0xe5   : > { %v348_v58 = vadd.f32 %v1876_v48, %v1714_v47  ;;  %v592_v18 = vpop.f32.mrf.mxu1 }
  0xe6   : > { %v337_v59 = vpop.f32.mrf.mxu0 }
  0xe7   : > { %v435_v6 = vadd.f32 %v1883_v36, %v348_v58  ;;  %v338_v7 = vadd.f32 %v1714_v47, %v337_v59 }
  0xe8   : > { %v1890_v14 = vpop.f32.mrf.mxu0 }
  0xe9   : > { %v429_v19 = vadd.f32 %v428_v40, %v338_v7  ;;  %v518_v20 = vadd.f32 %v1890_v14, %v435_v6 }
  0xea   : > { %v510_v24 = vpop.f32.mrf.mxu0 }
  0xeb   : > { %v601_v25 = vadd.f32 %v1897_v52, %v518_v20  ;;  %v511_v35 = vadd.f32 %v510_v24, %v429_v19 }
  0xec   : > { %v1904_v13 = vpop.f32.mrf.mxu0  ;;  %v1911_v12 = vpop.f32.mrf.mxu1 }
  0xed   : > { %v593_v8 = vadd.f32 %v592_v18, %v511_v35  ;;  %v684_v63 = vadd.f32 %v1904_v13, %v601_v25 }
  0xee   : > { %v677_v41 = vpop.f32.mrf.mxu0  ;;  %v756_v15 = vpop.f32.mrf.mxu1 }
  0xef   : > { %v763_v26 = vadd.f32 %v1911_v12, %v684_v63  ;;  %v678_v23 = vadd.f32 %v677_v41, %v593_v8 }
  0xf1   : > { %v1716_v9 = vmul.f32 -1.442695, %v763_v26  ;;  %v757_v48 = vadd.f32 %v756_v15, %v678_v23 }
  0xf3   : > { %2210 = vpow2.f32 %v1716_v9  ;;  %v1715_v36 = vmul.f32 -1.442695, %v757_v48 }
  0xf5   : > { %2212 = vpow2.f32 %v1715_v36 }
 0x100   : > { %v2211_v47 = vpop.eup %2210 }
 0x101   : > { %v773_v58 = vadd.f32 1.0, %v2211_v47 }
 0x102   : > { %v2213_v40 = vpop.eup %2212 }
 0x103   : > { %2214 = vrcp.f32 %v773_v58  ;;  %v772_v59 = vadd.f32 1.0, %v2213_v40 }
 0x105   : > { %2216 = vrcp.f32 %v772_v59 }
 0x110   : > { %v2215_v52 = vpop.eup %2214 }
 0x111   : > { %v2624_v6 = vand.u32 4294901760, %v2215_v52 }
 0x112   : > { %v2217_v7 = vpop.eup %2216 }
 0x113   : > { %v2626_v13 = vand.u32 4294901760, %v2217_v7  ;;  %v2629_v41 = vsub.f32 %v2215_v52, %v2624_v6 }
 0x115   : > { %1979 = vmatprep.mubr.f32.mxu1 %v2626_v13  ;;  %v883_v9 = vsub.f32 %v2217_v7, %v2626_v13  ;;  %v894_v15 = vand.u32 4294901760, %v2629_v41 }
 0x116   : > { %1980 = vmatmul.mubr.f32.vlgmr.msra.gmra.mxu1 %v2624_v6 }
 0x117   : > { %2018 = vmatpush3.msra.mxu1 %v2382_v27  ;;  %v884_v23 = vand.u32 4294901760, %v883_v9  ;;  %v895_v26 = vsub.f32 %v2629_v41, %v894_v15 }
 0x118   : > { %2019 = vmatprep.subr.mxu1 %v2390_v30 }
 0x119   : > { %2020 = vmatpush3.msra.mxu1 %v2390_v30  ;;  %2049 = vmatprep.mubr.f32.mxu1 %v884_v23  ;;  %v885_v63 = vsub.f32 %v883_v9, %v884_v23  ;;  %v896_v12 = vand.u32 4294901760, %v895_v26 }
 0x11a   : > { %2021 = vmatprep.subr.mxu1 %v2403_v34 }
 0x11b   : > { %2022 = vmatpush3.msra.mxu1 %v2403_v34  ;;  %v886_v8 = vand.u32 4294901760, %v885_v63 }
 0x11c   : > { %2023 = vmatprep.subr.mxu1 %v2418_v39 }
 0x11d   : > { %2024 = vmatpush3.msra.mxu1 %v2418_v39  ;;  %1944 = vmatprep.mubr.f32.mxu0 %v886_v8 }
 0x11e   : > { %2025 = vmatprep.subr.mxu1 %v2434_v45  ;;  %1945 = vmatmul.mubr.f32.vlgmr.msra.gmra.mxu0 %v896_v12 }
 0x11f   : > { %1983 = vmatpush3.msra.mxu0 %v2388_v29  ;;  %2026 = vmatpush3.msra.mxu1 %v2434_v45  ;;  %v2855_v29 = vld [vmem:[#allocation4_spill] sm:$0xff] }
 0x120   : > { %1984 = vmatprep.subr.mxu0 %v2401_v33  ;;  %2014 = vmatprep.mubr.f32.mxu0 %v883_v9 }
 0x121   : > { %2027 = vmatprep.subr.mxu1 %v2445_v50  ;;  %1985 = vmatpush3.msra.mxu0 %v2401_v33  ;;  %v2858_v33 = vld [vmem:[#allocation7_spill] sm:$0xff] }
 0x122   : > { %2028 = vmatpush3.msra.mxu1 %v2445_v50  ;;  %1986 = vmatprep.subr.mxu0 %v2416_v38 }
 0x123   : > { %2029 = vmatprep.subr.mxu1 %v2459_v56  ;;  %1987 = vmatpush3.msra.mxu0 %v2416_v38  ;;  %v2861_v38 = vld [vmem:[#allocation10_spill] sm:$0xff] }
 0x124   : > { %2030 = vmatpush3.msra.mxu1 %v2459_v56  ;;  %1988 = vmatprep.subr.mxu0 %v2431_v44 }
 0x125   : > { %2031 = vmatprep.subr.mxu1 %v2475_v62  ;;  %1989 = vmatpush3.msra.mxu0 %v2431_v44  ;;  %v1717_v44 = vld [vmem:[%s2824_s4] ss:$0 sm:$0xff] }
 0x126   : > { %2032 = vmatpush3.msra.mxu1 %v2475_v62  ;;  %1990 = vmatprep.subr.mxu0 %v2448_v51 }
 0x127   : > { %2033 = vmatprep.subr.mxu1 %v2492_v4  ;;  %1991 = vmatpush3.msra.mxu0 %v2448_v51 }
 0x128   : > { %2034 = vmatpush3.msra.mxu1 %v2492_v4  ;;  %1992 = vmatprep.subr.mxu0 %v2457_v55 }
 0x129   : > { %2035 = vmatprep.subr.mxu1 %v2508_v11  ;;  %1993 = vmatpush3.msra.mxu0 %v2457_v55 }
 0x12a   : > { %2036 = vmatpush3.msra.mxu1 %v2508_v11  ;;  %1994 = vmatprep.subr.mxu0 %v2473_v61 }
 0x12b   : > { %2037 = vmatprep.subr.mxu1 %v2519_v16  ;;  %1995 = vmatpush3.msra.mxu0 %v2473_v61 }
 0x12c   : > { %2038 = vmatpush3.msra.mxu1 %v2519_v16  ;;  %1996 = vmatprep.subr.mxu0 %v2490_v3 }
 0x12d   : > { %2039 = vmatprep.subr.mxu1 %v2534_v22  ;;  %1997 = vmatpush3.msra.mxu0 %v2490_v3 }
 0x12e   : > { %2040 = vmatpush3.msra.mxu1 %v2534_v22  ;;  %1998 = vmatprep.subr.mxu0 %v2505_v10 }
 0x12f   : > { %2041 = vmatprep.subr.mxu1 %v2550_v31  ;;  %1999 = vmatpush3.msra.mxu0 %v2505_v10 }
 0x130   : > { %2042 = vmatpush3.msra.mxu1 %v2550_v31  ;;  %2000 = vmatprep.subr.mxu0 %v2523_v17 }
 0x131   : > { %2043 = vmatprep.subr.mxu1 %v2567_v46  ;;  %2001 = vmatpush3.msra.mxu0 %v2523_v17 }
 0x132   : > { %2044 = vmatpush3.msra.mxu1 %v2567_v46  ;;  %2002 = vmatprep.subr.mxu0 %v2532_v21 }
 0x133   : > { %2045 = vmatprep.subr.mxu1 %v2576_v53  ;;  %2003 = vmatpush3.msra.mxu0 %v2532_v21 }
 0x134   : > { %2046 = vmatpush3.msra.mxu1 %v2576_v53  ;;  %2004 = vmatprep.subr.mxu0 %v2548_v28 }
 0x135   : > { %2047 = vmatprep.subr.mxu1 %v2578_v54  ;;  %2005 = vmatpush3.msra.mxu0 %v2548_v28 }
 0x136   : > { %2048 = vmatpush3.msra.mxu1 %v2578_v54  ;;  %2006 = vmatprep.subr.mxu0 %v2565_v42 }
 0x137   : > { %2050 = vmatmul.mubr.f32.vlgmr.msra.gmra.mxu1 %v894_v15  ;;  %2087 = vmatprep.subr.mxu1 %v2382_v27 }
 0x138   : > { %2007 = vmatpush3.msra.mxu0 %v2565_v42  ;;  %2088 = vmatpush3.msra.mxu1 %v2382_v27  ;;  %v2854_v27 = vld [vmem:[#allocation3_spill] sm:$0xff] }
 0x139   : > { %2119 = vmatprep.mubr.f32.mxu1 %v2626_v13  ;;  %2008 = vmatprep.subr.mxu0 %v2587_v0 }
 0x13a   : > { %2089 = vmatprep.subr.mxu1 %v2390_v30  ;;  %2009 = vmatpush3.msra.mxu0 %v2587_v0 }
 0x13b   : > { %2090 = vmatpush3.msra.mxu1 %v2390_v30  ;;  %2010 = vmatprep.subr.mxu0 %v2591_v1  ;;  %v2856_v30 = vld [vmem:[#allocation5_spill] sm:$0xff] }
 0x13c   : > { %2091 = vmatprep.subr.mxu1 %v2403_v34  ;;  %2011 = vmatpush3.msra.mxu0 %v2591_v1 }
 0x13d   : > { %2092 = vmatpush3.msra.mxu1 %v2403_v34  ;;  %2012 = vmatprep.subr.mxu0 %v2594_v5  ;;  %v2859_v34 = vld [vmem:[#allocation8_spill] sm:$0xff] }
 0x13e   : > { %2093 = vmatprep.subr.mxu1 %v2418_v39  ;;  %2013 = vmatpush3.msra.mxu0 %v2594_v5 }
 0x13f   : > { %2094 = vmatpush3.msra.mxu1 %v2418_v39  ;;  %2015 = vmatmul.mubr.f32.vlgmr.msra.gmra.mxu0 %v2629_v41  ;;  %v2862_v39 = vld [vmem:[#allocation11_spill] sm:$0xff] }
 0x140   : > { %2052 = vmatprep.subr.mxu0 %v2398_v32  ;;  %2095 = vmatprep.subr.mxu1 %v2434_v45 }
 0x141   : > { %2053 = vmatpush3.msra.mxu0 %v2398_v32  ;;  %2084 = vmatprep.mubr.f32.mxu0 %v2626_v13  ;;  %v2857_v32 = vld [vmem:[#allocation6_spill] sm:$0xff] }
 0x142   : > { %2096 = vmatpush3.msra.mxu1 %v2434_v45  ;;  %2054 = vmatprep.subr.mxu0 %v2413_v37 }
 0x143   : > { %2097 = vmatprep.subr.mxu1 %v2445_v50  ;;  %2055 = vmatpush3.msra.mxu0 %v2413_v37  ;;  %v2860_v37 = vld [vmem:[#allocation9_spill] sm:$0xff] }
 0x144   : > { %2098 = vmatpush3.msra.mxu1 %v2445_v50  ;;  %2056 = vmatprep.subr.mxu0 %v2428_v43 }
 0x145   : > { %2099 = vmatprep.subr.mxu1 %v2459_v56  ;;  %2057 = vmatpush3.msra.mxu0 %v2428_v43 }
 0x146   : > { %2100 = vmatpush3.msra.mxu1 %v2459_v56  ;;  %2058 = vmatprep.subr.mxu0 %v2443_v49 }
 0x147   : > { %2101 = vmatprep.subr.mxu1 %v2475_v62  ;;  %2059 = vmatpush3.msra.mxu0 %v2443_v49 }
 0x148   : > { %2102 = vmatpush3.msra.mxu1 %v2475_v62  ;;  %2060 = vmatprep.subr.mxu0 %v2463_v57 }
 0x149   : > { %2103 = vmatprep.subr.mxu1 %v2492_v4  ;;  %2061 = vmatpush3.msra.mxu0 %v2463_v57 }
 0x14a   : > { %2104 = vmatpush3.msra.mxu1 %v2492_v4  ;;  %2062 = vmatprep.subr.mxu0 %v2470_v60 }
 0x14b   : > { %2105 = vmatprep.subr.mxu1 %v2508_v11  ;;  %2063 = vmatpush3.msra.mxu0 %v2470_v60 }
 0x14c   : > { %2106 = vmatpush3.msra.mxu1 %v2508_v11  ;;  %2064 = vmatprep.subr.mxu0 %v2487_v2 }
 0x14d   : > { %2107 = vmatprep.subr.mxu1 %v2519_v16  ;;  %2065 = vmatpush3.msra.mxu0 %v2487_v2 }
 0x14e   : > { %2108 = vmatpush3.msra.mxu1 %v2519_v16  ;;  %2066 = vmatprep.subr.mxu0 %v2854_v27 }
 0x14f   : > { %2109 = vmatprep.subr.mxu1 %v2534_v22  ;;  %2067 = vmatpush3.msra.mxu0 %v2854_v27 }
 0x150   : > { %2110 = vmatpush3.msra.mxu1 %v2534_v22  ;;  %2068 = vmatprep.subr.mxu0 %v2855_v29 }
 0x151   : > { %2111 = vmatprep.subr.mxu1 %v2550_v31  ;;  %2069 = vmatpush3.msra.mxu0 %v2855_v29 }
 0x152   : > { %2112 = vmatpush3.msra.mxu1 %v2550_v31  ;;  %2070 = vmatprep.subr.mxu0 %v2856_v30 }
 0x153   : > { %2113 = vmatprep.subr.mxu1 %v2567_v46  ;;  %2071 = vmatpush3.msra.mxu0 %v2856_v30 }
 0x154   : > { %2114 = vmatpush3.msra.mxu1 %v2567_v46  ;;  %2072 = vmatprep.subr.mxu0 %v2857_v32 }
 0x155   : > { %2115 = vmatprep.subr.mxu1 %v2576_v53  ;;  %2073 = vmatpush3.msra.mxu0 %v2857_v32 }
 0x156   : > { %2116 = vmatpush3.msra.mxu1 %v2576_v53  ;;  %2074 = vmatprep.subr.mxu0 %v2858_v33 }
 0x157   : > { %2117 = vmatprep.subr.mxu1 %v2578_v54  ;;  %2075 = vmatpush3.msra.mxu0 %v2858_v33 }
 0x158   : > { %2118 = vmatpush3.msra.mxu1 %v2578_v54  ;;  %2076 = vmatprep.subr.mxu0 %v2859_v34 }
 0x159   : > { %2120 = vmatmul.mubr.f32.vlgmr.msra.gmra.mxu1 %v2624_v6  ;;  %2077 = vmatpush3.msra.mxu0 %v2859_v34 }
 0x15a   : > { %2078 = vmatprep.subr.mxu0 %v2860_v37 }
 0x15b   : > { %2079 = vmatpush3.msra.mxu0 %v2860_v37 }
 0x15c   : > { %2080 = vmatprep.subr.mxu0 %v2861_v38 }
 0x15d   : > { %2081 = vmatpush3.msra.mxu0 %v2861_v38 }
 0x15e   : > { %2082 = vmatprep.subr.mxu0 %v2862_v39 }
 0x15f   : > { %2083 = vmatpush3.msra.mxu0 %v2862_v39 }
 0x160   : > { %2085 = vmatmul.mubr.f32.vlgmr.msra.gmra.mxu0 %v2624_v6 }
 0x1d6   : > { %v1981_v45 = vpop.f32.mrf.mxu1 }
 0x1d8   : > { %v1049_v56 = vpop.f32.mrf.mxu1 }
 0x1de   : > { %v1946_v43 = vpop.f32.mrf.mxu0 }
 0x1df   : > { %v899_v50 = vadd.f32 %v1946_v43, %v1717_v44 }
 0x1e0   : > { %v888_v49 = vpop.f32.mrf.mxu0 }
 0x1e1   : > { %v889_v55 = vadd.f32 %v1717_v44, %v888_v49  ;;  %v1056_v57 = vadd.f32 %v1981_v45, %v899_v50 }
 0x1e3   : > { %v1050_v2 = vadd.f32 %v1049_v56, %v889_v55 }
 0x1f7   : > { %v2051_v60 = vpop.f32.mrf.mxu1 }
 0x1f9   : > { %v1255_v4 = vpop.f32.mrf.mxu1 }
 0x1ff   : > { %v2016_v51 = vpop.f32.mrf.mxu0 }
 0x200   : > { %v1167_v62 = vadd.f32 %v2016_v51, %v1056_v57 }
 0x201   : > { %v1159_v61 = vpop.f32.mrf.mxu0 }
 0x202   : > { %v1160_v3 = vadd.f32 %v1159_v61, %v1050_v2  ;;  %v1264_v10 = vadd.f32 %v2051_v60, %v1167_v62 }
 0x204   : > { %v1256_v21 = vadd.f32 %v1255_v4, %v1160_v3 }
 0x219   : > { %v2121_v11 = vpop.f32.mrf.mxu1 }
 0x21b   : > { %v1475_v42 = vpop.f32.mrf.mxu1 }
 0x220   : > { %v2086_v16 = vpop.f32.mrf.mxu0 }
 0x221   : > { %v1389_v17 = vadd.f32 %v2086_v16, %v1264_v10 }
 0x222   : > { %v1382_v22 = vpop.f32.mrf.mxu0 }
 0x223   : > { %v1482_v28 = vadd.f32 %v2121_v11, %v1389_v17  ;;  %v1383_v31 = vadd.f32 %v1382_v22, %v1256_v21  ;;  %1493 = sbr.rel (!%p2361_p4) target bundleno = 591 (0x24f), region = 44 }
 0x225   : > { %1486 = vst [vmem:[%s2775_s14 + $0x8] sm:$0xff] %v1482_v28  ;;  %v1476_v46 = vadd.f32 %v1475_v42, %v1383_v31 }
 0x227   : > { %1485 = vst [vmem:[%s2775_s14] sm:$0xff] %v1476_v46 }
 0x228   : > { %s2867_s18 = smov (!%p1496_p8, %s1495_s18), 2 }
 0x229   : > { %s1720_s23 = sshll.u32 %s2867_s18, 7 }
 0x22a   : > { %p1723_p9 = scmp.eq.s32.totalorder %s1720_s23, 0 }
 0x22b   : > { %s2792_s24 = sshrl.u32 (!%p1723_p9), %s2867_s18, 1 }
 0x22c   : > { %1504 = sbr.rel (%p1723_p9) target bundleno = 591 (0x24f), region = 48  ;;  %p1724_p10 = scmp.le.s32.totalorder (!%p1723_p9), %s2792_s24, 0 }
 0x231   : > { %1663 = sbr.rel (%p1724_p10) target bundleno = 574 (0x23e), region = 124  ;;  %s2274_s21 = smov (!%p1724_p10), %s2786_s20  }
 0x232   : > { %s2278_s26 = smov (!%p1724_p10), %s2775_s14   ;;  %s2282_s6 = smov (!%p1724_p10), 0  }
 0x233   : > { %s2286_s27 = smov (!%p1724_p10), 0  }
 0x236 LB: >> { %v1569_v53 = vld [vmem:[%s2280_s26] sm:$0xff]  ;;  %v1571_v54 = vld [vmem:[%s2280_s26 + $0x8] sm:$0xff]  ;;  %s1573_s28 = sadd.s32 1, %s2284_s6  ;;  %s1563_s27 = sadd.s32 1, %s2288_s27   ;;  %s2288_s27 = sphi %s2286_s27, %s1563_s27   ;;  %s2284_s6 = sphi %s2282_s6, %s2283_s6   ;;  %s2280_s26 = sphi %s2278_s26, %s1578_s26   ;;  %s2276_s21 = sphi %s2274_s21, %s1579_s21  }
 0x237   : >> { %1570 = vst [vmem:[%s2276_s21] sm:$0xff] %v1569_v53  ;;  %1572 = vst [vmem:[%s2276_s21 + $0x8] sm:$0xff] %v1571_v54  ;;  %p1574_p11 = scmp.ge.s32.totalorder %s1573_s28, %s2792_s24  ;;  %p1562_p12 = scmp.ge.s32.totalorder %s1563_s27, %s2792_s24 }
 0x239   : >> { %s2869_s28 = smov (%p1574_p11, %s1573_s28), 0  ;;  %1565 = sbr.rel (!%p1562_p12) target bundleno = 566 (0x236), region = 130 }
 0x23a   : >> { %s1725_s29 = sshll.u32 %s2869_s28, 4  ;;  %s2283_s6 = smov %s2869_s28  }
 0x23b   : >> { %s1578_s26 = scalar_lea.vmem %s2775_s14, %s1725_s29 [#allocation2]   ;;  %s1579_s21 = scalar_lea.vmem %s2786_s20, %s1725_s29  }
 0x23e PF: > { %s2802_s30 = sand.u32 1, %s2867_s18   ;;  %s1736_s7 = sshll.u32 %s2792_s24, 4 }
 0x23f   : > { %s1584_s8 = scalar_lea.vmem %s2775_s14, %s1736_s7 [#allocation2]   ;;  %s1586_s9 = scalar_lea.vmem %s2786_s20, %s1736_s7  }
 0x240   : > { %p1730_p13 = scmp.le.s32.totalorder %s2802_s30, 0 }
 0x241   : > { %s2290_s10 = smov (!%p1730_p13), %s1586_s9   ;;  %s2294_s11 = smov (!%p1730_p13), %s1584_s8  }
 0x242   : > { %1677 = sbr.rel (%p1730_p13) target bundleno = 591 (0x24f), region = 135  ;;  %s2298_s12 = smov (!%p1730_p13), 0  }
 0x243   : > { %s2302_s13 = smov (!%p1730_p13), 0  }
 0x247 LB: >> { %v1596_v0 = vld [vmem:[%s2296_s11] sm:$0xff]  ;;  %s1598_s18 = sadd.s32 1, %s2300_s12  ;;  %s1590_s13 = sadd.s32 1, %s2304_s13   ;;  %s2304_s13 = sphi %s2302_s13, %s1590_s13   ;;  %s2300_s12 = sphi %s2298_s12, %s2299_s12   ;;  %s2296_s11 = sphi %s2294_s11, %s1603_s11   ;;  %s2292_s10 = sphi %s2290_s10, %s1604_s10  }
 0x248   : >> { %1597 = vst [vmem:[%s2292_s10] sm:$0xff] %v1596_v0  ;;  %p1599_p0 = scmp.ge.s32.totalorder %s1598_s18, %s2802_s30  ;;  %p1589_p1 = scmp.ge.s32.totalorder %s1590_s13, %s2802_s30 }
 0x24a   : >> { %s2871_s18 = smov (%p1599_p0, %s1598_s18), 0  ;;  %1592 = sbr.rel (!%p1589_p1) target bundleno = 583 (0x247), region = 141 }
 0x24b   : >> { %s1731_s14 = sshll.u32 %s2871_s18, 3  ;;  %s2299_s12 = smov %s2871_s18  }
 0x24c   : >> { %s1603_s11 = scalar_lea.vmem %s1584_s8, %s1731_s14 [#allocation2]   ;;  %s1604_s10 = scalar_lea.vmem %s1586_s9, %s1731_s14  }
 0x24f PF: > { %p12_p2 = scmp.ge.s32.totalorder %s2351_s22, 6   ;;  %s2863_s18 = smov %s2268_s19 }
 0x250   : > { %s2864_s19 = smov %s2359_s25  ;;  %s2865_s20 = smov %s2351_s22 }
 0x251   :  { %14 = sbr.rel (!%p12_p2) target bundleno = 2 (0x2), region = 152 }

</bundles_post_ra>
